<compile_context>
chip_gen: v5e
topology: v5e:2x2
jax: 0.10.0
libtpu: 0.0.40
codegen_flags: <defaults>
</compile_context>

<pallas_src>
import jax
import jax.numpy as jnp
from jax.experimental import pallas as pl
from jax.experimental.pallas import tpu as pltpu

BN_EPS = 1e-5
LEAKY_SLOPE = 0.2
K_IN = 28 * 28          # 784


def _leaky_relu(x, slope=LEAKY_SLOPE):
    return jnp.where(x > 0, x, slope * x)


# ------------------------------ kernel ---------------------------------------

def disc_kernel(x_ref,
                w1_ref, b1_ref,
                w2_ref, b2_ref,
                w3_ref, b3_ref,
                w4_ref, b4_ref,
                o_ref):
    # x tile: (tile_b, 784) f32 straight from HBM; cast to bf16 on the VPU right
    # before the fc1 MXU dot (no wrapper-side pad/cast pass -> minimal HBM traffic).
    x = x_ref[...].astype(jnp.bfloat16)

    # fc1 -> leaky_relu -> drop1 (identity in eval mode)
    h = jnp.dot(x, w1_ref[...], preferred_element_type=jnp.float32) + b1_ref[...]
    h = _leaky_relu(h)                                            # (tile_b, 256) f32
    # TODO(synk): Dropout(p=0.5) implemented as eval-mode identity (training-mode
    # masking is stochastic and not part of a deterministic forward).

    # fc2 (BatchNorm2 folded into w2/b2) -> leaky_relu -> drop2
    h = jnp.dot(h.astype(jnp.bfloat16), w2_ref[...],
                preferred_element_type=jnp.float32) + b2_ref[...]
    h = _leaky_relu(h)                                            # (tile_b, 128) f32

    # fc3 (BatchNorm3 folded into w3/b3) -> leaky_relu -> drop3
    h = jnp.dot(h.astype(jnp.bfloat16), w3_ref[...],
                preferred_element_type=jnp.float32) + b3_ref[...]
    h = _leaky_relu(h)                                            # (tile_b, 32) f32

    # fc4: w4 is stored as an (8, 32) block whose row 0 holds the real weights
    # (rows 1..7 are zero padding).  Transposed-RHS contraction gives the result
    # directly in lane-dense (row) orientation: (8, tile_b).
    z8 = jax.lax.dot_general(
        w4_ref[...], h.astype(jnp.bfloat16),
        dimension_numbers=(((1,), (1,)), ((), ())),
        preferred_element_type=jnp.float32)                       # (8, tile_b)
    z = z8[0:1, :] + b4_ref[...]                                  # (1, tile_b)

    # sigmoid: exp + approximate reciprocal, both on the EUP slot.  approx=True
    # adds ~1e-3 relative error on the probability; switch to approx=False if
    # downstream code thresholds extremely close to 0.5.
    o_ref[...] = pl.reciprocal(1.0 + jnp.exp(-z), approx=True)


# ------------------------------ wrapper --------------------------------------

def discriminator_forward(x, packed, *, max_tile_b=2048):
    """x: (B, 28, 28) float -> (B,) float32 probabilities."""
    B = x.shape[0]
    x_flat = x.reshape(B, K_IN).astype(jnp.float32)   # free reshape, no HBM round trip

    (w1, b1, w2, b2, w3, b3, w4, b4) = packed

    # Batch tile: whole batch when it fits (no padded rows at all), otherwise
    # max_tile_b (2048 keeps the per-step DMA large vs the ~0.35us fixed
    # overhead while staying comfortable in v7x's 64 MiB VMEM).  Boundary
    # blocks (B not a multiple of tile_b) are masked by Pallas — the padded
    # rows' garbage never reaches HBM (and we do no cross-lane reductions).
    tile_b = B if B <= max_tile_b else max_tile_b
    n_tiles = pl.cdiv(B, tile_b)

    # Explicit VMEM budget: double-buffered f32 x tile + f32 activation temps +
    # resident bf16 weights, with headroom.  32 MiB floor covers v5e's 16 MiB
    # scoped default; the cap stays under v7x's 64 MiB physical VMEM per TC.
    x_tile_bytes = 2 * tile_b * K_IN * 4
    vmem_limit = int(min(56 * 1024 * 1024,
                         max(32 * 1024 * 1024, 2 * x_tile_bytes)))

    def resident(arr):
        # Whole-array block with a constant index_map -> DMA'd once and kept
        # VMEM-resident across grid steps.  (Default double-buffering of these
        # small operands costs ~0.5 MiB total — negligible vs the budget above.)
        return pl.BlockSpec(arr.shape, lambda i: (0, 0))

    weight_bytes = sum(int(a.size) * a.dtype.itemsize for a in packed)
    cost = pl.CostEstimate(
        flops=2 * B * (K_IN * 256 + 256 * 128 + 128 * 32 + 32 * 1),
        transcendentals=B,
        bytes_accessed=B * (K_IN * 4 + 4) + weight_bytes)

    out = pl.pallas_call(
        disc_kernel,
        out_shape=jax.ShapeDtypeStruct((1, B), jnp.float32),
        grid=(n_tiles,),
        in_specs=[
            pl.BlockSpec((tile_b, K_IN), lambda i: (i, 0)),   # x: tiled over batch
            resident(w1), resident(b1),
            resident(w2), resident(b2),
            resident(w3), resident(b3),
            resident(w4), resident(b4),
        ],
        out_specs=pl.BlockSpec((1, tile_b), lambda i: (0, i)),   # lane-dense row
        compiler_params=pltpu.CompilerParams(
            dimension_semantics=("parallel",),
            vmem_limit_bytes=vmem_limit),
        cost_estimate=cost,
    )(x_flat, w1, b1, w2, b2, w3, b3, w4, b4)

    return out.reshape(B)                                        # torch.squeeze(x, 1)


# ------------------------------ parameters -----------------------------------

def init_params(key):
    """Deterministic f32 init matching the PyTorch module's __init__ recipe."""
    keys = jax.random.split(key, 8)

    def kaiming_normal(k, fan_in, fan_out):
        # torch kaiming_normal_ default: fan_in mode, gain=sqrt(2)
        std = jnp.sqrt(2.0 / fan_in)
        return jax.random.normal(k, (fan_in, fan_out), jnp.float32) * std

    def xavier_normal_sigmoid(k, fan_in, fan_out):
        # gain('sigmoid') == 1.0
        std = jnp.sqrt(2.0 / (fan_in + fan_out))
        return jax.random.normal(k, (fan_in, fan_out), jnp.float32) * std

    def linear_bias(k, fan_in, fan_out):
        bound = 1.0 / jnp.sqrt(fan_in)
        return jax.random.uniform(k, (1, fan_out), jnp.float32, -bound, bound)

    w1 = kaiming_normal(keys[0], K_IN, 256)
    b1 = linear_bias(keys[1], K_IN, 256)
    w2 = kaiming_normal(keys[2], 256, 128)
    b2 = linear_bias(keys[3], 256, 128)
    w3 = kaiming_normal(keys[4], 128, 32)
    b3 = linear_bias(keys[5], 128, 32)
    w4 = xavier_normal_sigmoid(keys[6], 32, 1)
    b4 = linear_bias(keys[7], 32, 1)

    def bn_params(c):
        # rows: gamma(=1), beta(=0), running_mean(=0), running_var(=1)
        return jnp.stack([jnp.ones((c,), jnp.float32),
                          jnp.zeros((c,), jnp.float32),
                          jnp.zeros((c,), jnp.float32),
                          jnp.ones((c,), jnp.float32)], axis=0)

    return (w1, b1, w2, b2, bn_params(128), w3, b3, bn_params(32), w4, b4)


def fold_and_pack_params(params):
    """Fold eval-mode BN into fc2/fc3 and cast weights to bf16.

    NOTE: the BN fold is exact for eval mode only; re-derive the packed params
    if the running statistics change (training).
    """
    (w1, b1, w2, b2, bn2, w3, b3, bn3, w4, b4) = params

    def fold(w, b, bn):
        gamma, beta, mean, var = bn[0], bn[1], bn[2], bn[3]
        scale = gamma * jax.lax.rsqrt(var + BN_EPS)
        return w * scale[None, :], (b - mean[None, :]) * scale[None, :] + beta[None, :]

    w2f, b2f = fold(w2, b2, bn2)
    w3f, b3f = fold(w3, b3, bn3)

    # fc4 weight stored as an (8, 32) block: row 0 = real weights, rows 1..7 = 0.
    w4row = jnp.zeros((8, 32), jnp.float32).at[0, :].set(w4[:, 0])

    return (w1.astype(jnp.bfloat16), b1.astype(jnp.float32),
            w2f.astype(jnp.bfloat16), b2f.astype(jnp.float32),
            w3f.astype(jnp.bfloat16), b3f.astype(jnp.float32),
            w4row.astype(jnp.bfloat16),
            b4.astype(jnp.float32))            # (1, 1)


# ------------------------------ references -----------------------------------

def _batchnorm_eval(h, bn):
    gamma, beta, mean, var = bn[0:1], bn[1:2], bn[2:3], bn[3:4]
    return (h - mean) * gamma * jax.lax.rsqrt(var + BN_EPS) + beta


def reference_forward_f32(x, params):
    """Pure-JAX f32 reference with the original (unfolded) module semantics."""
    (w1, b1, w2, b2, bn2, w3, b3, bn3, w4, b4) = params
    h = x.reshape(x.shape[0], K_IN).astype(jnp.float32)
    h = _leaky_relu(h @ w1 + b1)
    h = _leaky_relu(_batchnorm_eval(h @ w2 + b2, bn2))
    h = _leaky_relu(_batchnorm_eval(h @ w3 + b3, bn3))
    z = h @ w4 + b4
    return jax.nn.sigmoid(z)[:, 0]


def reference_forward_packed(x, packed):
    """Mirrors the kernel arithmetic (bf16 weights/activations, f32 accumulation)."""
    (w1, b1, w2, b2, w3, b3, w4, b4) = packed
    B = x.shape[0]
    xb = x.reshape(B, K_IN).astype(jnp.bfloat16)
    h = _leaky_relu(jnp.dot(xb, w1, preferred_element_type=jnp.float32) + b1)
    h = _leaky_relu(jnp.dot(h.astype(jnp.bfloat16), w2,
                            preferred_element_type=jnp.float32) + b2)
    h = _leaky_relu(jnp.dot(h.astype(jnp.bfloat16), w3,
                            preferred_element_type=jnp.float32) + b3)
    z = jnp.dot(h.astype(jnp.bfloat16), w4[0:1, :].T,
                preferred_element_type=jnp.float32) + b4
    return jax.nn.sigmoid(z)[:, 0]


# ------------------------------ main -----------------------------------------

if __name__ == "__main__":
    key = jax.random.PRNGKey(0)
    pkey, xkey = jax.random.split(key)
    params = init_params(pkey)
    packed = fold_and_pack_params(params)

    B = 8
    x = jax.random.normal(xkey, (B, 28, 28), jnp.float32)

    y = discriminator_forward(x, packed)
    y = jax.block_until_ready(y)
    assert y.shape == (B,)

    y_bf16 = reference_forward_packed(x, packed)
    y_f32 = reference_forward_f32(x, params)

    # Strict check vs. a reference doing the same bf16-weight / f32-accum math.
    assert jnp.allclose(y, y_bf16, atol=1e-2, rtol=0.0), (y, y_bf16)
    # Loose check vs. the original full-f32 module semantics (bf16-level tol).
    assert jnp.allclose(y, y_f32, atol=5e-2, rtol=0.0), (y, y_f32)

    print("KERNEL_OK")
</pallas_src>

<mosaic_0001>
module attributes {stable_mosaic.version = 11 : i64} {
  func.func @disc_kernel(%arg0: i32, %arg1: memref<8x784xf32, #tpu.memory_space<vmem>>, %arg2: memref<784x256xbf16, #tpu.memory_space<vmem>>, %arg3: memref<1x256xf32, #tpu.memory_space<vmem>>, %arg4: memref<256x128xbf16, #tpu.memory_space<vmem>>, %arg5: memref<1x128xf32, #tpu.memory_space<vmem>>, %arg6: memref<128x32xbf16, #tpu.memory_space<vmem>>, %arg7: memref<1x32xf32, #tpu.memory_space<vmem>>, %arg8: memref<8x32xbf16, #tpu.memory_space<vmem>>, %arg9: memref<1x1xf32, #tpu.memory_space<vmem>>, %arg10: memref<1x8xf32, #tpu.memory_space<vmem>>) attributes {dimension_semantics = [#tpu.dimension_semantics<parallel>], iteration_bounds = array<i64: 1>, scalar_prefetch = 0 : i64, scratch_operands = 0 : i64, tpu.core_type = #tpu.core_type<tc>, window_params = [{transform_indices = @transform_0, window_bounds = array<i64: 8, 784>}, {pipeline_mode = #tpu.pipeline_mode<synchronous>, transform_indices = @transform_1, window_bounds = array<i64: 784, 256>}, {pipeline_mode = #tpu.pipeline_mode<synchronous>, transform_indices = @transform_2, window_bounds = array<i64: 1, 256>}, {pipeline_mode = #tpu.pipeline_mode<synchronous>, transform_indices = @transform_3, window_bounds = array<i64: 256, 128>}, {pipeline_mode = #tpu.pipeline_mode<synchronous>, transform_indices = @transform_4, window_bounds = array<i64: 1, 128>}, {pipeline_mode = #tpu.pipeline_mode<synchronous>, transform_indices = @transform_5, window_bounds = array<i64: 128, 32>}, {pipeline_mode = #tpu.pipeline_mode<synchronous>, transform_indices = @transform_6, window_bounds = array<i64: 1, 32>}, {pipeline_mode = #tpu.pipeline_mode<synchronous>, transform_indices = @transform_7, window_bounds = array<i64: 8, 32>}, {pipeline_mode = #tpu.pipeline_mode<synchronous>, transform_indices = @transform_8, window_bounds = array<i64: 1, 1>}, {transform_indices = @transform_9, window_bounds = array<i64: 1, 8>}]} {
    %c0 = arith.constant 0 : index
    %c0_0 = arith.constant 0 : index
    %0 = vector.load %arg1[%c0, %c0_0] : memref<8x784xf32, #tpu.memory_space<vmem>>, vector<8x784xf32>
    %1 = arith.truncf %0 : vector<8x784xf32> to vector<8x784xbf16>
    %c0_1 = arith.constant 0 : index
    %c0_2 = arith.constant 0 : index
    %2 = vector.load %arg2[%c0_1, %c0_2] : memref<784x256xbf16, #tpu.memory_space<vmem>>, vector<784x256xbf16>
    %cst = arith.constant dense<0.000000e+00> : vector<8x256xf32>
    %3 = tpu.matmul %1, %2, %cst {dimension_numbers = #tpu.dot_dimension_numbers<[1], [0], [0], [1], [0, 0, 1, 1], [], []>} : vector<8x784xbf16>, vector<784x256xbf16>, vector<8x256xf32> -> vector<8x256xf32>
    %c0_3 = arith.constant 0 : index
    %c0_4 = arith.constant 0 : index
    %4 = vector.load %arg3[%c0_3, %c0_4] : memref<1x256xf32, #tpu.memory_space<vmem>>, vector<1x256xf32>
    %5 = vector.broadcast %4 : vector<1x256xf32> to vector<8x256xf32>
    %6 = arith.addf %3, %5 : vector<8x256xf32>
    %cst_5 = arith.constant 0.000000e+00 : f32
    %7 = vector.broadcast %cst_5 : f32 to vector<8x256xf32>
    %8 = arith.cmpf ogt, %6, %7 : vector<8x256xf32>
    %cst_6 = arith.constant 2.000000e-01 : f32
    %9 = vector.broadcast %cst_6 : f32 to vector<8x256xf32>
    %10 = arith.mulf %9, %6 : vector<8x256xf32>
    %11 = arith.select %8, %6, %10 : vector<8x256xi1>, vector<8x256xf32>
    %12 = arith.truncf %11 : vector<8x256xf32> to vector<8x256xbf16>
    %c0_7 = arith.constant 0 : index
    %c0_8 = arith.constant 0 : index
    %13 = vector.load %arg4[%c0_7, %c0_8] : memref<256x128xbf16, #tpu.memory_space<vmem>>, vector<256x128xbf16>
    %cst_9 = arith.constant dense<0.000000e+00> : vector<8x128xf32>
    %14 = tpu.matmul %12, %13, %cst_9 {dimension_numbers = #tpu.dot_dimension_numbers<[1], [0], [0], [1], [0, 0, 1, 1], [], []>} : vector<8x256xbf16>, vector<256x128xbf16>, vector<8x128xf32> -> vector<8x128xf32>
    %c0_10 = arith.constant 0 : index
    %c0_11 = arith.constant 0 : index
    %15 = vector.load %arg5[%c0_10, %c0_11] : memref<1x128xf32, #tpu.memory_space<vmem>>, vector<1x128xf32>
    %16 = vector.broadcast %15 : vector<1x128xf32> to vector<8x128xf32>
    %17 = arith.addf %14, %16 : vector<8x128xf32>
    %cst_12 = arith.constant 0.000000e+00 : f32
    %18 = vector.broadcast %cst_12 : f32 to vector<8x128xf32>
    %19 = arith.cmpf ogt, %17, %18 : vector<8x128xf32>
    %cst_13 = arith.constant 2.000000e-01 : f32
    %20 = vector.broadcast %cst_13 : f32 to vector<8x128xf32>
    %21 = arith.mulf %20, %17 : vector<8x128xf32>
    %22 = arith.select %19, %17, %21 : vector<8x128xi1>, vector<8x128xf32>
    %23 = arith.truncf %22 : vector<8x128xf32> to vector<8x128xbf16>
    %c0_14 = arith.constant 0 : index
    %c0_15 = arith.constant 0 : index
    %24 = vector.load %arg6[%c0_14, %c0_15] : memref<128x32xbf16, #tpu.memory_space<vmem>>, vector<128x32xbf16>
    %cst_16 = arith.constant dense<0.000000e+00> : vector<8x32xf32>
    %25 = tpu.matmul %23, %24, %cst_16 {dimension_numbers = #tpu.dot_dimension_numbers<[1], [0], [0], [1], [0, 0, 1, 1], [], []>} : vector<8x128xbf16>, vector<128x32xbf16>, vector<8x32xf32> -> vector<8x32xf32>
    %c0_17 = arith.constant 0 : index
    %c0_18 = arith.constant 0 : index
    %26 = vector.load %arg7[%c0_17, %c0_18] : memref<1x32xf32, #tpu.memory_space<vmem>>, vector<1x32xf32>
    %27 = vector.broadcast %26 : vector<1x32xf32> to vector<8x32xf32>
    %28 = arith.addf %25, %27 : vector<8x32xf32>
    %cst_19 = arith.constant 0.000000e+00 : f32
    %29 = vector.broadcast %cst_19 : f32 to vector<8x32xf32>
    %30 = arith.cmpf ogt, %28, %29 : vector<8x32xf32>
    %cst_20 = arith.constant 2.000000e-01 : f32
    %31 = vector.broadcast %cst_20 : f32 to vector<8x32xf32>
    %32 = arith.mulf %31, %28 : vector<8x32xf32>
    %33 = arith.select %30, %28, %32 : vector<8x32xi1>, vector<8x32xf32>
    %c0_21 = arith.constant 0 : index
    %c0_22 = arith.constant 0 : index
    %34 = vector.load %arg8[%c0_21, %c0_22] : memref<8x32xbf16, #tpu.memory_space<vmem>>, vector<8x32xbf16>
    %35 = arith.truncf %33 : vector<8x32xf32> to vector<8x32xbf16>
    %cst_23 = arith.constant dense<0.000000e+00> : vector<8x8xf32>
    %36 = tpu.matmul %34, %35, %cst_23 {dimension_numbers = #tpu.dot_dimension_numbers<[1], [1], [0], [0], [0, 0, 1, 0], [], []>} : vector<8x32xbf16>, vector<8x32xbf16>, vector<8x8xf32> -> vector<8x8xf32>
    %37 = vector.extract_strided_slice %36 {offsets = [0, 0], sizes = [1, 8], strides = [1, 1]} : vector<8x8xf32> to vector<1x8xf32>
    %c0_24 = arith.constant 0 : index
    %c0_25 = arith.constant 0 : index
    %38 = vector.load %arg9[%c0_24, %c0_25] : memref<1x1xf32, #tpu.memory_space<vmem>>, vector<1x1xf32>
    %39 = vector.broadcast %38 : vector<1x1xf32> to vector<1x8xf32>
    %40 = arith.addf %37, %39 : vector<1x8xf32>
    %cst_26 = arith.constant 0.000000e+00 : f32
    %41 = vector.broadcast %cst_26 : f32 to vector<1x8xf32>
    %42 = arith.subf %41, %40 : vector<1x8xf32>
    %43 = math.exp %42 : vector<1x8xf32>
    %cst_27 = arith.constant 1.000000e+00 : f32
    %44 = vector.broadcast %cst_27 : f32 to vector<1x8xf32>
    %45 = arith.addf %44, %43 : vector<1x8xf32>
    %46 = tpu.reciprocal %45 {approx = true} : vector<1x8xf32> -> vector<1x8xf32>
    %c0_28 = arith.constant 0 : index
    %c0_29 = arith.constant 0 : index
    %47 = vector.load %arg10[%c0_28, %c0_29] : memref<1x8xf32, #tpu.memory_space<vmem>>, vector<1x8xf32>
    tpu.vector_store %arg10[%c0_28, %c0_29], %46 {strides = array<i32>} : memref<1x8xf32, #tpu.memory_space<vmem>>, vector<1x8xf32>,
    return
  }
  func.func @transform_0(%arg0: i32) -> (i32, i32) {
    %c0_i32 = arith.constant 0 : i32
    %c0_i32_0 = arith.constant 0 : i32
    return %arg0, %c0_i32 : i32, i32
  }
  func.func @transform_1(%arg0: i32) -> (i32, i32) {
    %c0_i32 = arith.constant 0 : i32
    %c0_i32_0 = arith.constant 0 : i32
    %c0_i32_1 = arith.constant 0 : i32
    return %c0_i32, %c0_i32_0 : i32, i32
  }
  func.func @transform_2(%arg0: i32) -> (i32, i32) {
    %c0_i32 = arith.constant 0 : i32
    %c0_i32_0 = arith.constant 0 : i32
    %c0_i32_1 = arith.constant 0 : i32
    return %c0_i32, %c0_i32_0 : i32, i32
  }
  func.func @transform_3(%arg0: i32) -> (i32, i32) {
    %c0_i32 = arith.constant 0 : i32
    %c0_i32_0 = arith.constant 0 : i32
    %c0_i32_1 = arith.constant 0 : i32
    return %c0_i32, %c0_i32_0 : i32, i32
  }
  func.func @transform_4(%arg0: i32) -> (i32, i32) {
    %c0_i32 = arith.constant 0 : i32
    %c0_i32_0 = arith.constant 0 : i32
    %c0_i32_1 = arith.constant 0 : i32
    return %c0_i32, %c0_i32_0 : i32, i32
  }
  func.func @transform_5(%arg0: i32) -> (i32, i32) {
    %c0_i32 = arith.constant 0 : i32
    %c0_i32_0 = arith.constant 0 : i32
    %c0_i32_1 = arith.constant 0 : i32
    return %c0_i32, %c0_i32_0 : i32, i32
  }
  func.func @transform_6(%arg0: i32) -> (i32, i32) {
    %c0_i32 = arith.constant 0 : i32
    %c0_i32_0 = arith.constant 0 : i32
    %c0_i32_1 = arith.constant 0 : i32
    return %c0_i32, %c0_i32_0 : i32, i32
  }
  func.func @transform_7(%arg0: i32) -> (i32, i32) {
    %c0_i32 = arith.constant 0 : i32
    %c0_i32_0 = arith.constant 0 : i32
    %c0_i32_1 = arith.constant 0 : i32
    return %c0_i32, %c0_i32_0 : i32, i32
  }
  func.func @transform_8(%arg0: i32) -> (i32, i32) {
    %c0_i32 = arith.constant 0 : i32
    %c0_i32_0 = arith.constant 0 : i32
    %c0_i32_1 = arith.constant 0 : i32
    return %c0_i32, %c0_i32_0 : i32, i32
  }
  func.func @transform_9(%arg0: i32) -> (i32, i32) {
    %c0_i32 = arith.constant 0 : i32
    %c0_i32_0 = arith.constant 0 : i32
    return %c0_i32, %arg0 : i32, i32
  }
}

</mosaic_0001>

<bundles_post_ra>
// kernel: tpu_custom_call.1
= control target key start
LH: loop header
LB: loop body
LE: loop exit
PB: predicated region body
PF: predicated region fallthrough
CT: control target
= control target key end

     0   :  { %s2034_s0 = inlined_call_operand.vmem [shape: f32[8,784], index: 0, kind: input, shape index: {}]   ;;  %s2035_s1 = inlined_call_operand.hbm [shape: bf16[784,256], index: 1, kind: input, shape index: {}]   ;;  %s2036_s2 = inlined_call_operand.vmem [shape: f32[1,256], index: 2, kind: input, shape index: {}]   ;;  %s2037_s3 = inlined_call_operand.hbm [shape: bf16[256,128], index: 3, kind: input, shape index: {}]   ;;  %s2038_s4 = inlined_call_operand.vmem [shape: f32[1,128], index: 4, kind: input, shape index: {}]   ;;  %s2039_s5 = inlined_call_operand.vmem [shape: bf16[128,32], index: 5, kind: input, shape index: {}]   ;;  %s2040_s6 = inlined_call_operand.vmem [shape: f32[1,32], index: 6, kind: input, shape index: {}]   ;;  %s2041_s7 = inlined_call_operand.vmem [shape: bf16[8,32], index: 7, kind: input, shape index: {}]   ;;  %s2042_s8 = inlined_call_operand.<no memory space> [shape: f32[1,1], index: 8, kind: input, shape index: {}]   ;;  %s2043_s9 = inlined_call_operand.hbm [shape: f32[1,8], index: 9, kind: output, shape index: {}]  }
   0x1   :  { %v14_v0 = vstv %s2042_s8 }
   0x2   :  { %15 = vst [vmem:[#allocation2] sm:$0x1] %v14_v0 }
   0x3   :  { %16 = vsyncpa [#allocation4], 0 }
   0x4   :  { %17 = vsyncpa [#allocation7], 0 }
   0x5   :  { %18 = vsyncpa [#allocation5], 0  ;;  %s25_s13 = sshll.u32 %s2035_s1, 4  ;;  %s1877_s14 = smov [#allocation3]   ;;  %s26_s13 = int_to_ptr.hbm [resolvable:$true] %s25_s13 }
   0x6   :  { %s27_s15 = sshll.u32 %s1877_s14, 4  ;;  %s40_s18 = sshll.u32 %s2037_s3, 4  ;;  %s28_s15 = int_to_ptr.vmem [resolvable:$true] %s27_s15  ;;  %s41_s18 = int_to_ptr.hbm [resolvable:$true] %s40_s18 }
   0x7   :  { %s1878_s19 = smov 128   ;;  %s1879_s20 = smov 8  }
   0x8   :  { %33 = dma.hbm_to_vmem [thread:$0]  %s26_s13, 12544, %s28_s15, [#allocation4], %s1878_s19, %s1878_s19, %s1879_s20  }
   0x9   :  { %s1880_s8 = smov [#allocation6]   ;;  %s1881_s22 = smov 64  }
   0xa   :  { %s42_s21 = sshll.u32 %s1880_s8, 4  ;;  %s1882_s23 = smov 4   ;;  %s43_s21 = int_to_ptr.vmem [resolvable:$true] %s42_s21 }
   0xb   :  { %48 = dma.hbm_to_vmem [thread:$0]  %s41_s18, 2048, %s43_s21, [#allocation7], %s1881_s22, %s1881_s22, %s1882_s23  }
   0xc   :  { %1871 = dma.done.wait [#allocation4], 12544  }
   0xd   :  { %1872 = vsyncadd [#allocation4], 4294954752 }
   0xe   :  { %1873 = dma.done.wait [#allocation7], 2048  }
   0xf   :  { %1874 = vsyncadd [#allocation7], 4294965248  ;;  %v1229_v1 = vld [vmem:[#allocation3 + $0x70] sm:$0xf]  ;;  %v1677_v2 = vld [vmem:[#allocation3 + $0x74] sm:$0xf0] }
  0x10   :  { %v1357_v3 = vld [vmem:[#allocation3 + $0x170] sm:$0xf]  ;;  %v1230_v4 = vor.u32 %v1677_v2, %v1229_v1  ;;  %v1709_v5 = vld [vmem:[#allocation3 + $0x174] sm:$0xf0]  ;;  %v1221_v12 = vld [vmem:[#allocation3 + $0x60] sm:$0xf] }
  0x11   :  { %v1421_v6 = vld [vmem:[#allocation3 + $0x1f0] sm:$0xf]  ;;  %v1725_v7 = vld [vmem:[#allocation3 + $0x1f4] sm:$0xf0]  ;;  %v1358_v8 = vor.u32 %v1709_v5, %v1357_v3  ;;  %v1675_v14 = vld [vmem:[#allocation3 + $0x64] sm:$0xf0] }
  0x12   :  { %v1422_v9 = vor.u32 %v1725_v7, %v1421_v6  ;;  %v1293_v10 = vld [vmem:[#allocation3 + $0xf0] sm:$0xf]  ;;  %v1693_v11 = vld [vmem:[#allocation3 + $0xf4] sm:$0xf0]  ;;  %680 = vmatpush.bf16.msra.mxu0 %v1230_v4  ;;  %v1349_v15 = vld [vmem:[#allocation3 + $0x160] sm:$0xf]  ;;  %v1222_v17 = vor.u32 %v1675_v14, %v1221_v12 }
  0x13   :  { %v1294_v13 = vor.u32 %v1693_v11, %v1293_v10  ;;  %v1707_v16 = vld [vmem:[#allocation3 + $0x164] sm:$0xf0]  ;;  %706 = vmatpush.bf16.msra.mxu2 %v1358_v8  ;;  %v1413_v19 = vld [vmem:[#allocation3 + $0x1e0] sm:$0xf]  ;;  %v1213_v24 = vld [vmem:[#allocation3 + $0x50] sm:$0xf] }
  0x14   :  { %719 = vmatpush.bf16.msra.mxu3 %v1422_v9  ;;  %v1350_v18 = vor.u32 %v1707_v16, %v1349_v15  ;;  %v1723_v20 = vld [vmem:[#allocation3 + $0x1e4] sm:$0xf0]  ;;  %v1285_v21 = vld [vmem:[#allocation3 + $0xe0] sm:$0xf]  ;;  %v1673_v25 = vld [vmem:[#allocation3 + $0x54] sm:$0xf0] }
  0x15   :  { %693 = vmatpush.bf16.msra.mxu1 %v1294_v13  ;;  %v1414_v22 = vor.u32 %v1723_v20, %v1413_v19  ;;  %v1691_v23 = vld [vmem:[#allocation3 + $0xe4] sm:$0xf0]  ;;  %v1341_v27 = vld [vmem:[#allocation3 + $0x150] sm:$0xf]  ;;  %v1705_v28 = vld [vmem:[#allocation3 + $0x154] sm:$0xf0]  ;;  %v1214_v30 = vor.u32 %v1673_v25, %v1213_v24 }
  0x16   :  { %v1286_v26 = vor.u32 %v1691_v23, %v1285_v21  ;;  %v1405_v29 = vld [vmem:[#allocation3 + $0x1d0] sm:$0xf]  ;;  %681 = vmatpush.bf16.msra.mxu0 %v1222_v17  ;;  %v1721_v31 = vld [vmem:[#allocation3 + $0x1d4] sm:$0xf0]  ;;  %v1342_v34 = vor.u32 %v1705_v28, %v1341_v27  ;;  %v1205_v36 = vld [vmem:[#allocation3 + $0x40] sm:$0xf] }
  0x17   :  { %v1277_v32 = vld [vmem:[#allocation3 + $0xd0] sm:$0xf]  ;;  %v1689_v33 = vld [vmem:[#allocation3 + $0xd4] sm:$0xf0]  ;;  %707 = vmatpush.bf16.msra.mxu2 %v1350_v18  ;;  %v1406_v35 = vor.u32 %v1721_v31, %v1405_v29  ;;  %v1671_v37 = vld [vmem:[#allocation3 + $0x44] sm:$0xf0] }
  0x18   :  { %720 = vmatpush.bf16.msra.mxu3 %v1414_v22  ;;  %v1333_v38 = vld [vmem:[#allocation3 + $0x140] sm:$0xf]  ;;  %v1278_v39 = vor.u32 %v1689_v33, %v1277_v32  ;;  %v1703_v40 = vld [vmem:[#allocation3 + $0x144] sm:$0xf0]  ;;  %v1206_v45 = vor.u32 %v1671_v37, %v1205_v36  ;;  %v1197_v48 = vld [vmem:[#allocation3 + $0x30] sm:$0xf] }
  0x19   :  { %694 = vmatpush.bf16.msra.mxu1 %v1286_v26  ;;  %v1397_v41 = vld [vmem:[#allocation3 + $0x1c0] sm:$0xf]  ;;  %v1719_v42 = vld [vmem:[#allocation3 + $0x1c4] sm:$0xf0]  ;;  %v1334_v46 = vor.u32 %v1703_v40, %v1333_v38  ;;  %v1669_v49 = vld [vmem:[#allocation3 + $0x34] sm:$0xf0] }
  0x1a   :  { %v1269_v43 = vld [vmem:[#allocation3 + $0xc0] sm:$0xf]  ;;  %v1687_v44 = vld [vmem:[#allocation3 + $0xc4] sm:$0xf0]  ;;  %682 = vmatpush.bf16.msra.mxu0 %v1214_v30  ;;  %v1398_v47 = vor.u32 %v1719_v42, %v1397_v41  ;;  %v1325_v50 = vld [vmem:[#allocation3 + $0x130] sm:$0xf]  ;;  %v1198_v57 = vor.u32 %v1669_v49, %v1197_v48 }
  0x1b   :  { %708 = vmatpush.bf16.msra.mxu2 %v1342_v34  ;;  %v1270_v51 = vor.u32 %v1687_v44, %v1269_v43  ;;  %v1701_v52 = vld [vmem:[#allocation3 + $0x134] sm:$0xf0]  ;;  %v1389_v53 = vld [vmem:[#allocation3 + $0x1b0] sm:$0xf]  ;;  %v1189_v60 = vld [vmem:[#allocation3 + $0x20] sm:$0xf] }
  0x1c   :  { %721 = vmatpush.bf16.msra.mxu3 %v1406_v35  ;;  %v1717_v54 = vld [vmem:[#allocation3 + $0x1b4] sm:$0xf0]  ;;  %v1261_v55 = vld [vmem:[#allocation3 + $0xb0] sm:$0xf]  ;;  %v1326_v58 = vor.u32 %v1701_v52, %v1325_v50  ;;  %v1667_v61 = vld [vmem:[#allocation3 + $0x24] sm:$0xf0] }
  0x1d   :  { %695 = vmatpush.bf16.msra.mxu1 %v1278_v39  ;;  %v1685_v56 = vld [vmem:[#allocation3 + $0xb4] sm:$0xf0]  ;;  %v1390_v59 = vor.u32 %v1717_v54, %v1389_v53  ;;  %v1317_v62 = vld [vmem:[#allocation3 + $0x120] sm:$0xf]  ;;  %v1699_v0 = vld [vmem:[#allocation3 + $0x124] sm:$0xf0]  ;;  %v1190_v5 = vor.u32 %v1667_v61, %v1189_v60 }
  0x1e   :  { %683 = vmatpush.bf16.msra.mxu0 %v1206_v45  ;;  %v1262_v63 = vor.u32 %v1685_v56, %v1261_v55  ;;  %v1381_v1 = vld [vmem:[#allocation3 + $0x1a0] sm:$0xf]  ;;  %v1715_v2 = vld [vmem:[#allocation3 + $0x1a4] sm:$0xf0]  ;;  %v1318_v6 = vor.u32 %v1699_v0, %v1317_v62  ;;  %v1181_v8 = vld [vmem:[#allocation3 + $0x10] sm:$0xf] }
  0x1f   :  { %709 = vmatpush.bf16.msra.mxu2 %v1334_v46  ;;  %v1253_v3 = vld [vmem:[#allocation3 + $0xa0] sm:$0xf]  ;;  %v1683_v4 = vld [vmem:[#allocation3 + $0xa4] sm:$0xf0]  ;;  %v1382_v7 = vor.u32 %v1715_v2, %v1381_v1  ;;  %v1665_v9 = vld [vmem:[#allocation3 + $0x14] sm:$0xf0] }
  0x20   :  { %722 = vmatpush.bf16.msra.mxu3 %v1398_v47  ;;  %v1309_v10 = vld [vmem:[#allocation3 + $0x110] sm:$0xf]  ;;  %v1254_v11 = vor.u32 %v1683_v4, %v1253_v3  ;;  %v1697_v12 = vld [vmem:[#allocation3 + $0x114] sm:$0xf0]  ;;  %v1182_v17 = vor.u32 %v1665_v9, %v1181_v8  ;;  %v1173_v18 = vld [vmem:[#allocation3] sm:$0xf] }
  0x21   :  { %696 = vmatpush.bf16.msra.mxu1 %v1270_v51  ;;  %v1373_v13 = vld [vmem:[#allocation3 + $0x190] sm:$0xf]  ;;  %v1713_v14 = vld [vmem:[#allocation3 + $0x194] sm:$0xf0]  ;;  %v1663_v19 = vld [vmem:[#allocation3 + $0x4] sm:$0xf0]  ;;  %v1310_v21 = vor.u32 %v1697_v12, %v1309_v10 }
  0x22   :  { %684 = vmatpush.bf16.msra.mxu0 %v1198_v57  ;;  %v1245_v15 = vld [vmem:[#allocation3 + $0x90] sm:$0xf]  ;;  %v1681_v16 = vld [vmem:[#allocation3 + $0x94] sm:$0xf0]  ;;  %v1301_v20 = vld [vmem:[#allocation3 + $0x100] sm:$0xf]  ;;  %v1374_v22 = vor.u32 %v1713_v14, %v1373_v13  ;;  %v1174_v33 = vor.u32 %v1663_v19, %v1173_v18 }
  0x23   :  { %710 = vmatpush.bf16.msra.mxu2 %v1326_v58  ;;  %v1695_v23 = vld [vmem:[#allocation3 + $0x104] sm:$0xf0]  ;;  %v1365_v24 = vld [vmem:[#allocation3 + $0x180] sm:$0xf]  ;;  %v1246_v26 = vor.u32 %v1681_v16, %v1245_v15  ;;  %v1485_v27 = vld [vmem:[#allocation3 + $0x270] sm:$0xf] }
  0x24   :  { %723 = vmatpush.bf16.msra.mxu3 %v1390_v59  ;;  %v1711_v25 = vld [vmem:[#allocation3 + $0x184] sm:$0xf0]  ;;  %v1741_v28 = vld [vmem:[#allocation3 + $0x274] sm:$0xf0]  ;;  %v1676_v29 = vld [vmem:[#allocation3 + $0x74] sm:$0xf]  ;;  %v1302_v37 = vor.u32 %v1695_v23, %v1301_v20 }
  0x25   :  { %697 = vmatpush.bf16.msra.mxu1 %v1262_v63  ;;  %v1231_v30 = vld [vmem:[#allocation3 + $0x78] sm:$0xf0]  ;;  %v1237_v31 = vld [vmem:[#allocation3 + $0x80] sm:$0xf]  ;;  %v1679_v32 = vld [vmem:[#allocation3 + $0x84] sm:$0xf0]  ;;  %v1366_v38 = vor.u32 %v1711_v25, %v1365_v24  ;;  %v1486_v42 = vor.u32 %v1741_v28, %v1485_v27 }
  0x26   :  { %685 = vmatpush.bf16.msra.mxu0 %v1190_v5  ;;  %v70_v34 = vld [vmem:[%s2034_s0 + $0x10] sm:$0xff]  ;;  %v1557_v35 = vld [vmem:[#allocation3 + $0x300] sm:$0xf]  ;;  %v1759_v36 = vld [vmem:[#allocation3 + $0x304] sm:$0xf0]  ;;  %v1234_v43 = vor.u32 %v1676_v29, %v1231_v30  ;;  %v1238_v47 = vor.u32 %v1679_v32, %v1237_v31  ;;  %vm676_vm0 = vcmask 130048  }
  0x27   :  { %711 = vmatpush.bf16.msra.mxu2 %v1318_v6  ;;  %v1549_v39 = vld [vmem:[#allocation3 + $0x2f0] sm:$0xf]  ;;  %v1757_v40 = vld [vmem:[#allocation3 + $0x2f4] sm:$0xf0]  ;;  %v1692_v41 = vld [vmem:[#allocation3 + $0xf4] sm:$0xf]  ;;  %v1558_v48 = vor.u32 %v1759_v36, %v1557_v35  ;;  %v1950_v52 = vpack.c.bf16 %v70_v34, %v70_v34 }
  0x28   :  { %724 = vmatpush.bf16.msra.mxu3 %v1382_v7  ;;  %v1295_v44 = vld [vmem:[#allocation3 + $0xf8] sm:$0xf0]  ;;  %v1477_v45 = vld [vmem:[#allocation3 + $0x260] sm:$0xf]  ;;  %v1739_v49 = vld [vmem:[#allocation3 + $0x264] sm:$0xf0]  ;;  %v1550_v53 = vor.u32 %v1757_v40, %v1549_v39 }
  0x29   :  { %698 = vmatpush.bf16.msra.mxu1 %v1254_v11  ;;  %v68_v46 = vld [vmem:[%s2034_s0] sm:$0xff]  ;;  %v1223_v51 = vld [vmem:[#allocation3 + $0x68] sm:$0xf0]  ;;  %v71_v54 = vld [vmem:[%s2034_s0 + $0x18] sm:$0xff]  ;;  %v1298_v56 = vor.u32 %v1692_v41, %v1295_v44  ;;  %v1478_v60 = vor.u32 %v1739_v49, %v1477_v45  ;;  %vm1118_vm5 = vcmask 261120   ;;  %s1160_s14 = sshll.u32 %s2043_s9, 4  ;;  %s1161_s14 = int_to_ptr.hbm [resolvable:$true] %s1160_s14 }
  0x2a   :  { %686 = vmatpush.bf16.msra.mxu0 %v1182_v17  ;;  %v1674_v50 = vld [vmem:[#allocation3 + $0x64] sm:$0xf]  ;;  %v1541_v57 = vld [vmem:[#allocation3 + $0x2e0] sm:$0xf]  ;;  %v1755_v58 = vld [vmem:[#allocation3 + $0x2e4] sm:$0xf0]  ;;  %v1958_v59 = vpack.c.bf16 %v68_v46, %v68_v46  ;;  %v1960_v4 = vpack.c.bf16 %v71_v54, %v71_v54 }
  0x2b   :  { %712 = vmatpush.bf16.msra.mxu2 %v1310_v21  ;;  %v69_v55 = vld [vmem:[%s2034_s0 + $0x8] sm:$0xff]  ;;  %v1226_v61 = vor.u32 %v1674_v50, %v1223_v51  ;;  %v1469_v0 = vld [vmem:[#allocation3 + $0x250] sm:$0xf]  ;;  %v1737_v1 = vld [vmem:[#allocation3 + $0x254] sm:$0xf0]  ;;  %v1542_v6 = vor.u32 %v1755_v58, %v1541_v57  ;;  %vm1151_vm6 = vcmask 57344  }
  0x2c   :  { %725 = vmatpush.bf16.msra.mxu3 %v1374_v22  ;;  %v1690_v62 = vld [vmem:[#allocation3 + $0xe4] sm:$0xf]  ;;  %v1287_v63 = vld [vmem:[#allocation3 + $0xe8] sm:$0xf0]  ;;  %v1672_v2 = vld [vmem:[#allocation3 + $0x54] sm:$0xf]  ;;  %v1962_v5 = vpack.c.bf16 %v69_v55, %v69_v55  ;;  %v1470_v10 = vor.u32 %v1737_v1, %v1469_v0 }
  0x2d   :  { %699 = vmatpush.bf16.msra.mxu1 %v1246_v26  ;;  %v1215_v3 = vld [vmem:[#allocation3 + $0x58] sm:$0xf0]  ;;  %v1290_v7 = vor.u32 %v1690_v62, %v1287_v63  ;;  %v1533_v8 = vld [vmem:[#allocation3 + $0x2d0] sm:$0xf]  ;;  %v1753_v9 = vld [vmem:[#allocation3 + $0x2d4] sm:$0xf0] }
  0x2e   :  { %687 = vmatpush.bf16.msra.mxu0 %v1174_v33  ;;  %v1218_v11 = vor.u32 %v1672_v2, %v1215_v3  ;;  %v1688_v12 = vld [vmem:[#allocation3 + $0xd4] sm:$0xf]  ;;  %v1279_v13 = vld [vmem:[#allocation3 + $0xd8] sm:$0xf0]  ;;  %v1461_v14 = vld [vmem:[#allocation3 + $0x240] sm:$0xf]  ;;  %v1534_v18 = vor.u32 %v1753_v9, %v1533_v8 }
  0x2f   :  { %713 = vmatpush.bf16.msra.mxu2 %v1302_v37  ;;  %v1735_v15 = vld [vmem:[#allocation3 + $0x244] sm:$0xf0]  ;;  %v1670_v16 = vld [vmem:[#allocation3 + $0x44] sm:$0xf]  ;;  %v1207_v17 = vld [vmem:[#allocation3 + $0x48] sm:$0xf0]  ;;  %v1282_v19 = vor.u32 %v1688_v12, %v1279_v13 }
  0x30   :  { %726 = vmatpush.bf16.msra.mxu3 %v1366_v38  ;;  %v1525_v20 = vld [vmem:[#allocation3 + $0x2c0] sm:$0xf]  ;;  %v1751_v21 = vld [vmem:[#allocation3 + $0x2c4] sm:$0xf0]  ;;  %v1462_v22 = vor.u32 %v1735_v15, %v1461_v14  ;;  %v1210_v23 = vor.u32 %v1670_v16, %v1207_v17  ;;  %v1686_v24 = vld [vmem:[#allocation3 + $0xc4] sm:$0xf] }
  0x31   :  { %700 = vmatpush.bf16.msra.mxu1 %v1238_v47  ;;  %688 = vmatmul.bf16.vlgmr.msra.gmra.mxu0 %v1958_v59  ;;  %v1271_v25 = vld [vmem:[#allocation3 + $0xc8] sm:$0xf0]  ;;  %v1453_v26 = vld [vmem:[#allocation3 + $0x230] sm:$0xf]  ;;  %v1733_v27 = vld [vmem:[#allocation3 + $0x234] sm:$0xf0]  ;;  %v1526_v30 = vor.u32 %v1751_v21, %v1525_v20 }
  0x32   :  { %732 = vmatpush.bf16.msrb.mxu0 %v1486_v42  ;;  %714 = vmatmul.bf16.vlgmr.msra.gmra.mxu2 %v1950_v52  ;;  %v1668_v28 = vld [vmem:[#allocation3 + $0x34] sm:$0xf]  ;;  %v1199_v29 = vld [vmem:[#allocation3 + $0x38] sm:$0xf0]  ;;  %v1274_v31 = vor.u32 %v1686_v24, %v1271_v25  ;;  %v1517_v32 = vld [vmem:[#allocation3 + $0x2b0] sm:$0xf]  ;;  %v1454_v35 = vor.u32 %v1733_v27, %v1453_v26 }
  0x33   :  { %765 = vmatpush.bf16.msrb.mxu2 %v1558_v48  ;;  %727 = vmatmul.bf16.vlgmr.msra.gmra.mxu3 %v1960_v4  ;;  %v1749_v33 = vld [vmem:[#allocation3 + $0x2b4] sm:$0xf0]  ;;  %v74_v34 = vld [vmem:[%s2034_s0 + $0x30] sm:$0xff]  ;;  %v1202_v36 = vor.u32 %v1668_v28, %v1199_v29  ;;  %v1263_v38 = vld [vmem:[#allocation3 + $0xb8] sm:$0xf0] }
  0x34   :  { %771 = vmatpush.bf16.msrb.mxu3 %v1234_v43  ;;  %701 = vmatmul.bf16.vlgmr.msra.gmra.mxu1 %v1962_v5  ;;  %v1684_v37 = vld [vmem:[#allocation3 + $0xb4] sm:$0xf]  ;;  %v1445_v39 = vld [vmem:[#allocation3 + $0x220] sm:$0xf]  ;;  %v1731_v40 = vld [vmem:[#allocation3 + $0x224] sm:$0xf0]  ;;  %v1518_v43 = vor.u32 %v1749_v33, %v1517_v32  ;;  %v1971_v44 = vpack.c.bf16 %v74_v34, %v74_v34 }
  0x35   :  { %745 = vmatpush.bf16.msrb.mxu1 %v1550_v53  ;;  %v1666_v41 = vld [vmem:[#allocation3 + $0x24] sm:$0xf]  ;;  %v1191_v42 = vld [vmem:[#allocation3 + $0x28] sm:$0xf0]  ;;  %v1266_v45 = vor.u32 %v1684_v37, %v1263_v38  ;;  %v1509_v46 = vld [vmem:[#allocation3 + $0x2a0] sm:$0xf]  ;;  %v1446_v48 = vor.u32 %v1731_v40, %v1445_v39 }
  0x36   :  { %733 = vmatpush.bf16.msrb.mxu0 %v1478_v60  ;;  %v1747_v47 = vld [vmem:[#allocation3 + $0x2a4] sm:$0xf0]  ;;  %v1194_v49 = vor.u32 %v1666_v41, %v1191_v42  ;;  %v1682_v50 = vld [vmem:[#allocation3 + $0xa4] sm:$0xf]  ;;  %v1255_v51 = vld [vmem:[#allocation3 + $0xa8] sm:$0xf0] }
  0x37   :  { %784 = vmatpush.bf16.msra.mxu2 %v1298_v56  ;;  %v1437_v53 = vld [vmem:[#allocation3 + $0x210] sm:$0xf]  ;;  %v1729_v54 = vld [vmem:[#allocation3 + $0x214] sm:$0xf0]  ;;  %v1664_v55 = vld [vmem:[#allocation3 + $0x14] sm:$0xf]  ;;  %v1510_v57 = vor.u32 %v1747_v47, %v1509_v46  ;;  %v1258_v58 = vor.u32 %v1682_v50, %v1255_v51 }
  0x38   :  { %772 = vmatpush.bf16.msrb.mxu3 %v1226_v61  ;;  %v1183_v56 = vld [vmem:[#allocation3 + $0x18] sm:$0xf0]  ;;  %v1501_v60 = vld [vmem:[#allocation3 + $0x290] sm:$0xf]  ;;  %v1745_v61 = vld [vmem:[#allocation3 + $0x294] sm:$0xf0]  ;;  %v1438_v63 = vor.u32 %v1729_v54, %v1437_v53 }
  0x39   :  { %746 = vmatpush.bf16.msrb.mxu1 %v1542_v6  ;;  %v1680_v62 = vld [vmem:[#allocation3 + $0x94] sm:$0xf]  ;;  %v1186_v0 = vor.u32 %v1664_v55, %v1183_v56  ;;  %v1247_v1 = vld [vmem:[#allocation3 + $0x98] sm:$0xf0]  ;;  %v1429_v2 = vld [vmem:[#allocation3 + $0x200] sm:$0xf]  ;;  %v1502_v9 = vor.u32 %v1745_v61, %v1501_v60 }
  0x3a   :  { %734 = vmatpush.bf16.msrb.mxu0 %v1470_v10  ;;  %v1727_v3 = vld [vmem:[#allocation3 + $0x204] sm:$0xf0]  ;;  %v1662_v6 = vld [vmem:[#allocation3 + $0x4] sm:$0xf]  ;;  %v1708_v8 = vld [vmem:[#allocation3 + $0x174] sm:$0xf]  ;;  %v1250_v13 = vor.u32 %v1680_v62, %v1247_v1 }
  0x3b   :  { %785 = vmatpush.bf16.msra.mxu2 %v1290_v7  ;;  %v1175_v7 = vld [vmem:[#allocation3 + $0x8] sm:$0xf0]  ;;  %v1359_v10 = vld [vmem:[#allocation3 + $0x178] sm:$0xf0]  ;;  %v1493_v14 = vld [vmem:[#allocation3 + $0x280] sm:$0xf]  ;;  %v1430_v17 = vor.u32 %v1727_v3, %v1429_v2 }
  0x3c   :  { %773 = vmatpush.bf16.msrb.mxu3 %v1218_v11  ;;  %v1740_v11 = vld [vmem:[#allocation3 + $0x274] sm:$0xf]  ;;  %v1487_v12 = vld [vmem:[#allocation3 + $0x278] sm:$0xf0]  ;;  %v1743_v15 = vld [vmem:[#allocation3 + $0x284] sm:$0xf0] }
  0x3d   :  { %747 = vmatpush.bf16.msrb.mxu1 %v1534_v18  ;;  %v72_v16 = vld [vmem:[%s2034_s0 + $0x20] sm:$0xff]  ;;  %v1178_v18 = vor.u32 %v1662_v6, %v1175_v7  ;;  %v1239_v20 = vld [vmem:[#allocation3 + $0x88] sm:$0xf0]  ;;  %v1724_v21 = vld [vmem:[#allocation3 + $0x1f4] sm:$0xf]  ;;  %v1494_v27 = vor.u32 %v1743_v15, %v1493_v14 }
  0x3e   :  { %735 = vmatpush.bf16.msrb.mxu0 %v1462_v22  ;;  %v1362_v22 = vor.u32 %v1708_v8, %v1359_v10  ;;  %v1423_v24 = vld [vmem:[#allocation3 + $0x1f8] sm:$0xf0]  ;;  %v1756_v25 = vld [vmem:[#allocation3 + $0x2f4] sm:$0xf]  ;;  %v73_v28 = vld [vmem:[%s2034_s0 + $0x28] sm:$0xff] }
  0x3f   :  { %786 = vmatpush.bf16.msra.mxu2 %v1282_v19  ;;  %v1678_v19 = vld [vmem:[#allocation3 + $0x84] sm:$0xf]  ;;  %v1551_v26 = vld [vmem:[#allocation3 + $0x2f8] sm:$0xf0]  ;;  %v1479_v34 = vld [vmem:[#allocation3 + $0x268] sm:$0xf0]  ;;  %v1983_v38 = vpack.c.bf16 %v73_v28, %v73_v28 }
  0x40   :  { %774 = vmatpush.bf16.msrb.mxu3 %v1210_v23  ;;  %v1490_v23 = vor.u32 %v1740_v11, %v1487_v12  ;;  %v1706_v29 = vld [vmem:[#allocation3 + $0x164] sm:$0xf]  ;;  %v1242_v32 = vor.u32 %v1678_v19, %v1239_v20  ;;  %v1415_v40 = vld [vmem:[#allocation3 + $0x1e8] sm:$0xf0]  ;;  %v1343_v46 = vld [vmem:[#allocation3 + $0x158] sm:$0xf0] }
  0x41   :  { %748 = vmatpush.bf16.msrb.mxu1 %v1526_v30  ;;  %v1351_v30 = vld [vmem:[#allocation3 + $0x168] sm:$0xf0]  ;;  %v1738_v33 = vld [vmem:[#allocation3 + $0x264] sm:$0xf]  ;;  %v1736_v47 = vld [vmem:[#allocation3 + $0x254] sm:$0xf] }
  0x42   :  { %736 = vmatpush.bf16.msrb.mxu0 %v1454_v35  ;;  %1563 = vmatmul.msk.bf16.vlgmr.msrb.gmra.mxu2 %vm676_vm0, %v1971_v44  ;;  %v1426_v35 = vor.u32 %v1724_v21, %v1423_v24  ;;  %v1722_v37 = vld [vmem:[#allocation3 + $0x1e4] sm:$0xf]  ;;  %v1354_v39 = vor.u32 %v1706_v29, %v1351_v30  ;;  %v1543_v42 = vld [vmem:[#allocation3 + $0x2e8] sm:$0xf0]  ;;  %v1720_v51 = vld [vmem:[#allocation3 + $0x1d4] sm:$0xf] }
  0x43   :  { %787 = vmatpush.bf16.msra.mxu2 %v1274_v31  ;;  %v1981_v31 = vpack.c.bf16 %v72_v16, %v72_v16  ;;  %v1754_v41 = vld [vmem:[#allocation3 + $0x2e4] sm:$0xf]  ;;  %v1407_v54 = vld [vmem:[#allocation3 + $0x1d8] sm:$0xf0]  ;;  %v1752_v55 = vld [vmem:[#allocation3 + $0x2d4] sm:$0xf] }
  0x44   :  { %775 = vmatpush.bf16.msrb.mxu3 %v1202_v36  ;;  %v1554_v36 = vor.u32 %v1756_v25, %v1551_v26  ;;  %v1546_v50 = vor.u32 %v1754_v41, %v1543_v42  ;;  %v1535_v56 = vld [vmem:[#allocation3 + $0x2d8] sm:$0xf0]  ;;  %v1335_v60 = vld [vmem:[#allocation3 + $0x148] sm:$0xf0]  ;;  %v1734_v61 = vld [vmem:[#allocation3 + $0x244] sm:$0xf] }
  0x45   :  { %749 = vmatpush.bf16.msrb.mxu1 %v1518_v43  ;;  %v1482_v43 = vor.u32 %v1738_v33, %v1479_v34  ;;  %v1463_v62 = vld [vmem:[#allocation3 + $0x248] sm:$0xf0]  ;;  %v1718_v1 = vld [vmem:[#allocation3 + $0x1c4] sm:$0xf]  ;;  %v1327_v10 = vld [vmem:[#allocation3 + $0x138] sm:$0xf0] }
  0x46   :  { %737 = vmatpush.bf16.msrb.mxu0 %v1446_v48  ;;  %v1471_v48 = vld [vmem:[#allocation3 + $0x258] sm:$0xf0]  ;;  %v1399_v3 = vld [vmem:[#allocation3 + $0x1c8] sm:$0xf0]  ;;  %v1750_v6 = vld [vmem:[#allocation3 + $0x2c4] sm:$0xf]  ;;  %v1466_v8 = vor.u32 %v1734_v61, %v1463_v62 }
  0x47   :  { %788 = vmatpush.bf16.msra.mxu2 %v1266_v45  ;;  %v1704_v45 = vld [vmem:[#allocation3 + $0x154] sm:$0xf]  ;;  %v1527_v7 = vld [vmem:[#allocation3 + $0x2c8] sm:$0xf0]  ;;  %v1402_v12 = vor.u32 %v1718_v1, %v1399_v3  ;;  %v1391_v15 = vld [vmem:[#allocation3 + $0x1b8] sm:$0xf0] }
  0x48   :  { %776 = vmatpush.bf16.msrb.mxu3 %v1194_v49  ;;  %v1418_v49 = vor.u32 %v1722_v37, %v1415_v40  ;;  %v1346_v53 = vor.u32 %v1704_v45, %v1343_v46  ;;  %v1732_v11 = vld [vmem:[#allocation3 + $0x234] sm:$0xf]  ;;  %v1698_v19 = vld [vmem:[#allocation3 + $0x124] sm:$0xf]  ;;  %v1319_v20 = vld [vmem:[#allocation3 + $0x128] sm:$0xf0] }
  0x49   :  { %750 = vmatpush.bf16.msrb.mxu1 %v1510_v57  ;;  %v1474_v57 = vor.u32 %v1736_v47, %v1471_v48  ;;  %v1748_v16 = vld [vmem:[#allocation3 + $0x2b4] sm:$0xf]  ;;  %v1730_v21 = vld [vmem:[#allocation3 + $0x224] sm:$0xf]  ;;  %v1322_v26 = vor.u32 %v1698_v19, %v1319_v20  ;;  %v1511_v29 = vld [vmem:[#allocation3 + $0x2a8] sm:$0xf0] }
  0x4a   :  { %738 = vmatpush.bf16.msrb.mxu0 %v1438_v63  ;;  %v1410_v63 = vor.u32 %v1720_v51, %v1407_v54  ;;  %v1714_v25 = vld [vmem:[#allocation3 + $0x1a4] sm:$0xf]  ;;  %v1311_v33 = vld [vmem:[#allocation3 + $0x118] sm:$0xf0]  ;;  %v1728_v34 = vld [vmem:[#allocation3 + $0x214] sm:$0xf] }
  0x4b   :  { %789 = vmatpush.bf16.msra.mxu2 %v1258_v58  ;;  %v1702_v58 = vld [vmem:[#allocation3 + $0x144] sm:$0xf]  ;;  %v1375_v41 = vld [vmem:[#allocation3 + $0x198] sm:$0xf0]  ;;  %v1744_v42 = vld [vmem:[#allocation3 + $0x294] sm:$0xf] }
  0x4c   :  { %777 = vmatpush.bf16.msrb.mxu3 %v1186_v0  ;;  %v1538_v0 = vor.u32 %v1752_v55, %v1535_v56  ;;  %v1338_v2 = vor.u32 %v1702_v58, %v1335_v60  ;;  %v1746_v28 = vld [vmem:[#allocation3 + $0x2a4] sm:$0xf]  ;;  %v1303_v47 = vld [vmem:[#allocation3 + $0x108] sm:$0xf0]  ;;  %v1765_v3 = vld [vmem:[#allocation6 + $0x28] sm:$0xff] }
  0x4d   :  { %751 = vmatpush.bf16.msrb.mxu1 %v1502_v9  ;;  %v1700_v9 = vld [vmem:[#allocation3 + $0x134] sm:$0xf]  ;;  %v1514_v37 = vor.u32 %v1746_v28, %v1511_v29  ;;  %v1694_v46 = vld [vmem:[#allocation3 + $0x104] sm:$0xf]  ;;  %v1559_v51 = vld [vmem:[#allocation3 + $0x308] sm:$0xf0] }
  0x4e   :  { %739 = vmatpush.bf16.msrb.mxu0 %v1430_v17  ;;  %v1330_v14 = vor.u32 %v1700_v9, %v1327_v10  ;;  %v1519_v17 = vld [vmem:[#allocation3 + $0x2b8] sm:$0xf0]  ;;  %v1726_v48 = vld [vmem:[#allocation3 + $0x204] sm:$0xf]  ;;  %v1306_v55 = vor.u32 %v1694_v46, %v1303_v47  ;;  %v1495_v61 = vld [vmem:[#allocation3 + $0x288] sm:$0xf0] }
  0x4f   :  { %790 = vmatpush.bf16.msra.mxu2 %v1250_v13  ;;  %v1716_v13 = vld [vmem:[#allocation3 + $0x1b4] sm:$0xf]  ;;  %v1522_v24 = vor.u32 %v1748_v16, %v1519_v17  ;;  %v1710_v56 = vld [vmem:[#allocation3 + $0x184] sm:$0xf]  ;;  %v1767_v1 = vld [vmem:[#allocation6 + $0x38] sm:$0xff] }
  0x50   :  { %778 = vmatpush.bf16.msrb.mxu3 %v1178_v18  ;;  %v1742_v60 = vld [vmem:[#allocation3 + $0x284] sm:$0xf]  ;;  %v1773_v20 = vld [vmem:[#allocation6 + $0x68] sm:$0xff]  ;;  %v1771_v29 = vld [vmem:[#allocation6 + $0x58] sm:$0xff] }
  0x51   :  { %752 = vmatpush.bf16.msrb.mxu1 %v1494_v27  ;;  %740 = vmatmul.bf16.vlgmr.msrb.gmra.mxu0 %v1981_v31  ;;  %v1383_v27 = vld [vmem:[#allocation3 + $0x1a8] sm:$0xf0] }
  0x52   :  { %797 = vmatpush.bf16.msra.mxu0 %v1362_v22  ;;  %v1447_v22 = vld [vmem:[#allocation3 + $0x228] sm:$0xf0] }
  0x53   :  { %791 = vmatpush.bf16.msra.mxu2 %v1242_v32  ;;  %779 = vmatmul.bf16.vlgmr.msrb.gmra.mxu3 %v1958_v59  ;;  %v1530_v59 = vor.u32 %v1750_v6, %v1527_v7  ;;  %v1450_v30 = vor.u32 %v1730_v21, %v1447_v22  ;;  %v1696_v32 = vld [vmem:[#allocation3 + $0x114] sm:$0xf]  ;;  %v1763_v7 = vld [vmem:[#allocation6 + $0x18] sm:$0xff] }
  0x54   :  { %823 = vmatpush.bf16.msra.mxu3 %v1490_v23  ;;  %753 = vmatmul.bf16.vlgmr.msrb.gmra.mxu1 %v1983_v38  ;;  %v1394_v23 = vor.u32 %v1716_v13, %v1391_v15  ;;  %v1314_v40 = vor.u32 %v1696_v32, %v1311_v33  ;;  %v1764_v6 = vld [vmem:[#allocation6 + $0x20] sm:$0xff]  ;;  %v1770_v33 = vld [vmem:[#allocation6 + $0x50] sm:$0xff] }
  0x55   :  { %810 = vmatpush.bf16.msra.mxu1 %v1426_v35  ;;  %v1439_v35 = vld [vmem:[#allocation3 + $0x218] sm:$0xf0] }
  0x56   :  { %798 = vmatpush.bf16.msra.mxu0 %v1354_v39  ;;  %792 = vmatmul.bf16.vlgmr.msra.gmra.mxu2 %v1962_v5  ;;  %v1455_v5 = vld [vmem:[#allocation3 + $0x238] sm:$0xf0]  ;;  %v1712_v39 = vld [vmem:[#allocation3 + $0x194] sm:$0xf]  ;;  %v1442_v45 = vor.u32 %v1728_v34, %v1439_v35 }
  0x57   :  { %836 = vmatpush.bf16.msrb.mxu2 %v1554_v36  ;;  %v1458_v18 = vor.u32 %v1732_v11, %v1455_v5  ;;  %v1386_v36 = vor.u32 %v1714_v25, %v1383_v27  ;;  %v1775_v5 = vld [vmem:[#allocation6 + $0x78] sm:$0xff]  ;;  %v1772_v25 = vld [vmem:[#allocation6 + $0x60] sm:$0xff] }
  0x58   :  { %824 = vmatpush.bf16.msra.mxu3 %v1482_v43  ;;  %v1503_v43 = vld [vmem:[#allocation3 + $0x298] sm:$0xf0] }
  0x59   :  { %811 = vmatpush.bf16.msra.mxu1 %v1418_v49  ;;  %v1431_v49 = vld [vmem:[#allocation3 + $0x208] sm:$0xf0]  ;;  %v1506_v54 = vor.u32 %v1744_v42, %v1503_v43  ;;  %v1768_v42 = vld [vmem:[#allocation6 + $0x40] sm:$0xff] }
  0x5a   :  { %799 = vmatpush.bf16.msra.mxu0 %v1346_v53  ;;  %v1378_v53 = vor.u32 %v1712_v39, %v1375_v41  ;;  %v1434_v58 = vor.u32 %v1726_v48, %v1431_v49 }
  0x5b   :  { %837 = vmatpush.bf16.msrb.mxu2 %v1546_v50  ;;  %v1758_v50 = vld [vmem:[#allocation3 + $0x304] sm:$0xf] }
  0x5c   :  { %825 = vmatpush.bf16.msra.mxu3 %v1474_v57  ;;  %v1367_v57 = vld [vmem:[#allocation3 + $0x188] sm:$0xf0]  ;;  %v1562_v62 = vor.u32 %v1758_v50, %v1559_v51 }
  0x5d   :  { %812 = vmatpush.bf16.msra.mxu1 %v1410_v63  ;;  %v1370_v63 = vor.u32 %v1710_v56, %v1367_v57 }
  0x5e   :  { %800 = vmatpush.bf16.msra.mxu0 %v1338_v2  ;;  %v1766_v2 = vld [vmem:[#allocation6 + $0x30] sm:$0xff] }
  0x5f   :  { %838 = vmatpush.bf16.msrb.mxu2 %v1538_v0  ;;  %v1498_v0 = vor.u32 %v1742_v60, %v1495_v61 }
  0x60   :  { %826 = vmatpush.bf16.msra.mxu3 %v1466_v8  ;;  %v1761_v8 = vld [vmem:[#allocation6 + $0x8] sm:$0xff] }
  0x61   :  { %813 = vmatpush.bf16.msra.mxu1 %v1402_v12 }
  0x62   :  { %801 = vmatpush.bf16.msra.mxu0 %v1330_v14  ;;  %v1774_v14 = vld [vmem:[#allocation6 + $0x70] sm:$0xff] }
  0x63   :  { %839 = vmatpush.bf16.msrb.mxu2 %v1530_v59 }
  0x64   :  { %827 = vmatpush.bf16.msra.mxu3 %v1458_v18 }
  0x65   :  { %814 = vmatpush.bf16.msra.mxu1 %v1394_v23 }
  0x66   :  { %802 = vmatpush.bf16.msra.mxu0 %v1322_v26 }
  0x67   :  { %840 = vmatpush.bf16.msrb.mxu2 %v1522_v24 }
  0x68   :  { %828 = vmatpush.bf16.msra.mxu3 %v1450_v30 }
  0x69   :  { %815 = vmatpush.bf16.msra.mxu1 %v1386_v36 }
  0x6a   :  { %803 = vmatpush.bf16.msra.mxu0 %v1314_v40  ;;  %v1769_v40 = vld [vmem:[#allocation6 + $0x48] sm:$0xff] }
  0x6b   :  { %841 = vmatpush.bf16.msrb.mxu2 %v1514_v37 }
  0x6c   :  { %829 = vmatpush.bf16.msra.mxu3 %v1442_v45 }
  0x6d   :  { %816 = vmatpush.bf16.msra.mxu1 %v1378_v53 }
  0x6e   :  { %804 = vmatpush.bf16.msra.mxu0 %v1306_v55 }
  0x6f   :  { %842 = vmatpush.bf16.msrb.mxu2 %v1506_v54 }
  0x70   :  { %830 = vmatpush.bf16.msra.mxu3 %v1434_v58 }
  0x71   :  { %817 = vmatpush.bf16.msra.mxu1 %v1370_v63  ;;  %805 = vmatmul.bf16.vlgmr.msra.gmra.mxu0 %v1950_v52  ;;  %v1762_v52 = vld [vmem:[#allocation6 + $0x10] sm:$0xff] }
  0x72   :  { %856 = vmatpush.bf16.msrb.mxu0 %v1562_v62 }
  0x73   :  { %831 = vmatmul.bf16.vlgmr.msra.gmra.mxu3 %v1981_v31  ;;  %843 = vmatpush.bf16.msrb.mxu2 %v1498_v0 }
  0x74   :  { %818 = vmatmul.bf16.vlgmr.msra.gmra.mxu1 %v1960_v4  ;;  %1015 = vmatpush.bf16.msrb.mxu3 %v1775_v5 }
  0x75   :  { %1002 = vmatpush.bf16.msrb.mxu1 %v1767_v1 }
  0x76   :  { %844 = vmatmul.bf16.vlgmr.msrb.gmra.mxu2 %v1983_v38  ;;  %v1760_v38 = vld [vmem:[#allocation6] sm:$0xff] }
  0x78   :  { %1016 = vmatpush.bf16.msrb.mxu3 %v1774_v14 }
  0x79   :  { %1003 = vmatpush.bf16.msrb.mxu1 %v1766_v2 }
  0x7c   :  { %1017 = vmatpush.bf16.msrb.mxu3 %v1773_v20 }
  0x7d   :  { %1004 = vmatpush.bf16.msrb.mxu1 %v1765_v3 }
  0x80   :  { %1018 = vmatpush.bf16.msrb.mxu3 %v1772_v25 }
  0x81   :  { %1564 = vmatmul.msk.bf16.vlgmr.msrb.gmra.mxu0 %vm676_vm0, %v1971_v44  ;;  %1005 = vmatpush.bf16.msrb.mxu1 %v1764_v6  ;;  %v180_v44 = vld [vmem:[%s2036_s2] sm:$0x3]  ;;  %v1783_v6 = vld [vmem:[%s2039_s5 + $0x38] sm:$0xff] }
  0x82   :  { %v182_v59 = vperm.slane %v180_v44, 0  ;;  %v183_v45 = vperm.slane %v180_v44, 1  ;;  %1100 = vmatpush.bf16.msra.mxu0 %v1783_v6  ;;  %v1777_v44 = vld [vmem:[%s2039_s5 + $0x8] sm:$0xff] }
  0x84   :  { %1019 = vmatpush.bf16.msrb.mxu3 %v1771_v29 }
  0x85   :  { %1006 = vmatpush.bf16.msrb.mxu1 %v1763_v7  ;;  %v1782_v7 = vld [vmem:[%s2039_s5 + $0x30] sm:$0xff] }
  0x86   :  { %1101 = vmatpush.bf16.msra.mxu0 %v1782_v7 }
  0x88   :  { %1020 = vmatpush.bf16.msrb.mxu3 %v1770_v33 }
  0x89   :  { %1007 = vmatpush.bf16.msrb.mxu1 %v1762_v52  ;;  %v1781_v52 = vld [vmem:[%s2039_s5 + $0x28] sm:$0xff] }
  0x8a   :  { %1102 = vmatpush.bf16.msra.mxu0 %v1781_v52 }
  0x8c   :  { %1021 = vmatpush.bf16.msrb.mxu3 %v1769_v40 }
  0x8d   :  { %1008 = vmatpush.bf16.msrb.mxu1 %v1761_v8  ;;  %v1779_v8 = vld [vmem:[%s2039_s5 + $0x18] sm:$0xff] }
  0x90   :  { %1022 = vmatpush.bf16.msrb.mxu3 %v1768_v42 }
  0x91   :  { %1009 = vmatpush.bf16.msrb.mxu1 %v1760_v38 }
  0xae   :  { %v689_v31 = vpop.f32.mrf.mxu0 }
  0xaf   :  { %v690_v15 = vadd.f32 %v689_v31, %v182_v59  ;;  %v1780_v31 = vld [vmem:[%s2039_s5 + $0x20] sm:$0xff] }
  0xb0   :  { %1103 = vmatpush.bf16.msra.mxu0 %v1780_v31 }
  0xb1   :  { %v702_v4 = vpop.f32.mrf.mxu1 }
  0xb2   :  { %v703_v17 = vadd.f32 %v702_v4, %v690_v15  ;;  %v1778_v4 = vld [vmem:[%s2039_s5 + $0x10] sm:$0xff] }
  0xb4   :  { %1104 = vmatpush.bf16.msra.mxu0 %v1779_v8 }
  0xb5   :  { %v715_v9 = vpop.f32.mrf.mxu2 }
  0xb6   :  { %v728_v10 = vpop.f32.mrf.mxu3  ;;  %v691_v11 = vpop.f32.mrf.mxu0  ;;  %v716_v19 = vadd.f32 %v715_v9, %v703_v17  ;;  %v1138_v17 = vld [vmem:[#allocation2] sm:$0x1] }
  0xb7   :  { %v1793_v11 = vld [vmem:[%s2038_s4] ss:$0 sm:$0xff] }
  0xb8   :  { %v729_v21 = vadd.f32 %v728_v10, %v716_v19  ;;  %1105 = vmatpush.bf16.msra.mxu0 %v1778_v4  ;;  %v1776_v10 = vld [vmem:[%s2039_s5] sm:$0xff] }
  0xb9   :  { %v704_v12 = vpop.f32.mrf.mxu1  ;;  %v1794_v19 = vld [vmem:[%s2040_s6] ss:$0 sm:$0xff]  ;;  %s1884_s6 = smov [#allocation8]  }
  0xba   :  { %s1158_s11 = sshll.u32 %s1884_s6, 4  ;;  %s1159_s11 = int_to_ptr.vmem [resolvable:$true] %s1158_s11 }
  0xbc   :  { %1106 = vmatpush.bf16.msra.mxu0 %v1777_v44 }
  0xbd   :  { %v717_v13 = vpop.f32.mrf.mxu2 }
  0xbe   :  { %v730_v16 = vpop.f32.mrf.mxu3 }
  0xc0   :  { %1107 = vmatpush.bf16.msra.mxu0 %v1776_v10 }
  0xc5   :  { %v767_v18 = vpop.f32.mrf.mxu2 }
  0xcd   :  { %v769_v24 = vpop.f32.mrf.mxu2 }
  0xce   :  { %v741_v22 = vpop.f32.mrf.mxu0 }
  0xcf   :  { %v742_v23 = vadd.f32 %v741_v22, %v729_v21 }
  0xd1   :  { %v754_v26 = vpop.f32.mrf.mxu1 }
  0xd2   :  { %v755_v27 = vadd.f32 %v754_v26, %v742_v23 }
  0xd4   :  { %v768_v28 = vadd.f32 %v767_v18, %v755_v27  ;;  %v1883_v18 = vmov 0   ;;  %v1116_v27 = vld [vmem:[%s2041_s7] sm:$0xf] }
  0xd5   :  { %1792 = vset.pattern.permute.xlu0 %v1883_v18 }
  0xd6   :  { %vm862_vm1 = vcmp.gt.f32.partialorder %v768_v28, 0.0  ;;  %v864_v30 = vmul.f32 0.2, %v768_v28  ;;  %v743_v32 = vpop.f32.mrf.mxu0  ;;  %v780_v37 = vpop.f32.mrf.mxu3  ;;  %1141 = vperm.xlu0 %1792, %v1138_v17  }
  0xd7   :  { %v781_v46 = vadd.f32 %v780_v37, %v183_v45 }
  0xd8   :  { %v866_v34 = vsel %vm862_vm1, %v768_v28, %v864_v30 }
  0xd9   :  { %v793_v35 = vpop.f32.mrf.mxu2  ;;  %v868_v36 = vpack.c.bf16 %v866_v34, %v866_v34  ;;  %v756_v39 = vpop.f32.mrf.mxu1 }
  0xda   :  { %v794_v48 = vadd.f32 %v793_v35, %v781_v46 }
  0xdb   :  { %1010 = vmatmul.bf16.vlgmr.msrb.gmra.mxu1 %v868_v36 }
  0xde   :  { %v782_v43 = vpop.f32.mrf.mxu3 }
  0xe1   :  { %v795_v41 = vpop.f32.mrf.mxu2 }
  0xee   :  { %v806_v47 = vpop.f32.mrf.mxu0 }
  0xef   :  { %v807_v50 = vadd.f32 %v806_v47, %v794_v48 }
  0xf1   :  { %v819_v49 = vpop.f32.mrf.mxu1 }
  0xf2   :  { %v820_v54 = vadd.f32 %v819_v49, %v807_v50 }
  0xf6   :  { %v832_v51 = vpop.f32.mrf.mxu3  ;;  %v808_v53 = vpop.f32.mrf.mxu0 }
  0xf7   :  { %v833_v56 = vadd.f32 %v832_v51, %v820_v54 }
  0xf9   :  { %v845_v55 = vpop.f32.mrf.mxu2  ;;  %v821_v57 = vpop.f32.mrf.mxu1 }
  0xfa   :  { %v846_v58 = vadd.f32 %v845_v55, %v833_v56 }
  0xfe   :  { %v834_v60 = vpop.f32.mrf.mxu3  ;;  %v858_v61 = vpop.f32.mrf.mxu0 }
  0xff   :  { %v859_v62 = vadd.f32 %v858_v61, %v846_v58 }
 0x101   :  { %v847_v63 = vpop.f32.mrf.mxu2  ;;  %vm863_vm2 = vcmp.gt.f32.partialorder %v859_v62, 0.0  ;;  %v865_v0 = vmul.f32 0.2, %v859_v62 }
 0x103   :  { %v867_v1 = vsel %vm863_vm2, %v859_v62, %v865_v0 }
 0x104   :  { %v869_v2 = vpack.c.bf16 %v867_v1, %v867_v1 }
 0x106   :  { %v860_v3 = vpop.f32.mrf.mxu0  ;;  %1023 = vmatmul.bf16.vlgmr.msrb.gmra.mxu3 %v869_v2 }
 0x148   :  { %v1142_v28 = vpop.permute.xlu0 %1141 }
 0x149   :  { %v1144_v29 = vperm.slane %v1142_v28, 0 }
 0x158   :  { %v1011_v38 = vpop.f32.mrf.mxu1 }
 0x159   :  { %v1012_v5 = vadd.f32 %v1793_v11, %v1011_v38 }
 0x160   :  { %v1013_v9 = vpop.f32.mrf.mxu1 }
 0x189   :  { %v1024_v12 = vpop.f32.mrf.mxu3 }
 0x18a   :  { %v1025_v59 = vadd.f32 %v1024_v12, %v1012_v5 }
 0x18c   :  { %vm1028_vm3 = vcmp.gt.f32.partialorder %v1025_v59, 0.0  ;;  %v1029_v13 = vmul.f32 0.2, %v1025_v59 }
 0x18e   :  { %v1030_v14 = vsel %vm1028_vm3, %v1025_v59, %v1029_v13 }
 0x18f   :  { %v1031_v15 = vpack.c.bf16 %v1030_v14, %v1030_v14 }
 0x191   :  { %v1026_v16 = vpop.f32.mrf.mxu3  ;;  %1108 = vmatmul.bf16.vlgmr.msra.gmra.mxu0 %v1031_v15 }
 0x20e   :  { %v1109_v20 = vpop.f32.mrf.mxu0 }
 0x20f   :  { %v1110_v21 = vadd.f32 %v1794_v19, %v1109_v20 }
 0x211   :  { %vm1113_vm4 = vcmp.gt.f32.partialorder %v1110_v21, 0.0  ;;  %v1114_v22 = vmul.f32 0.2, %v1110_v21 }
 0x213   :  { %v1115_v23 = vsel %vm1113_vm4, %v1110_v21, %v1114_v22 }
 0x214   :  { %v1117_v24 = vpack.c.bf16 %v1115_v23, %v1115_v23 }
 0x216   :  { %v1111_v25 = vpop.f32.mrf.mxu0  ;;  %v1123_v26 = vsel %vm1118_vm5, %v1117_v24, 0 }
 0x217   :  { %1132 = vmatpush.bf16.xpose.msra.mxu2 %v1123_v26 }
 0x21e   :  { %1661 = vmatmul.msk.bf16.vlgmr.msra.gmra.mxu2 %vm1118_vm5, %v1116_v27 }
 0x2a1   :  { %v1134_v30 = vpop.f32.mrf.mxu2 }
 0x2a2   :  { %v1145_v32 = vadd.f32 %v1144_v29, %v1134_v30 }
 0x2a4   :  { %v1146_v33 = vsub.f32 0.0, %v1145_v32 }
 0x2a6   :  { %v1147_v34 = vmul.f32 1.442695, %v1146_v33 }
 0x2a8   :  { %1795 = vpow2.f32 %v1147_v34 }
 0x2a9   :  { %v1136_v35 = vpop.f32.mrf.mxu2 }
 0x2ae   :  { %v1796_v36 = vpop.eup %1795 }
 0x2af   :  { %v1149_v37 = vadd.f32 1.0, %v1796_v36 }
 0x2b1   :  { %1797 = vrcp.f32 %v1149_v37 }
 0x2b7   :  { %v1798_v39 = vpop.eup %1797 }
 0x2b8   :  { %1152 = vst.msk [vmem:[#allocation8] sm:$0x1] %vm1151_vm6, %v1798_v39 }
 0x2b9   :  { %1163 = dma.vmem_to_hbm [thread:$0]  %s1159_s11, 16, %s1161_s14, [#allocation5]  }
 0x2ba   :  { %1875 = dma.done.wait [#allocation5], 16  }
 0x2bb   :  { %1876 = vsyncadd [#allocation5], 4294967280 }
 0x2bc   :  { %1168 = vsyncpa [#allocation4], 1 }
 0x2bd   :  { %1169 = vsyncpa [#allocation7], 1 }
 0x2be   :  { %1170 = vsyncpa [#allocation5], 1 }

</bundles_post_ra>
